<compile_context>
chip_gen: v7x
topology: tpu7x:2x2x1
jax: 0.10.0
libtpu: 0.0.40
codegen_flags: <defaults>
</compile_context>

<pallas_src>
import jax
import jax.numpy as jnp
from jax.experimental import pallas as pl
from jax.experimental.pallas import tpu as pltpu

N_OBSERVATIONS = 13
N_ACTIONS = 4
HIDDEN = 1024
K_PAD = 16          # padded layer-1 contraction dim (13 -> 16)
TK = 256            # hidden-dim tile (4 grid steps over HIDDEN=1024)


def dqn_kernel(x_ref, w1_ref, b1_ref, w2_ref, b2_ref, w3_ref, b3_ref,
               o_ref, h1_ref):
    k = pl.program_id(0)

    @pl.when(k == 0)
    def _():
        # Layer 1 + ReLU, computed once; stays resident in VMEM scratch.
        h1 = jnp.dot(x_ref[...].astype(jnp.bfloat16), w1_ref[...],
                     preferred_element_type=jnp.float32)
        h1_ref[...] = jnp.maximum(h1 + b1_ref[...], 0.0)
        # Output block is the f32 accumulator; start it at the final bias.
        o_ref[...] = jnp.broadcast_to(b3_ref[...], o_ref.shape)

    # Layer 2: this step's TK columns of h2 (f32 accumulate, ReLU in f32).
    h1_bf16 = h1_ref[...].astype(jnp.bfloat16)
    h2 = jnp.dot(h1_bf16, w2_ref[...], preferred_element_type=jnp.float32)
    h2 = jnp.maximum(h2 + b2_ref[...], 0.0)

    # Layer 3: accumulate this hidden chunk's contribution into the output.
    o_ref[...] += jnp.dot(h2.astype(jnp.bfloat16), w3_ref[...],
                          preferred_element_type=jnp.float32)


def dqn_forward(x, params):
    """x: (B, 13) float32. params: w1/w2/w3 bf16 stored as (in, out), b* f32."""
    B = x.shape[0]
    w1, b1 = params["w1"], params["b1"]
    w2, b2 = params["w2"], params["b2"]
    w3, b3 = params["w3"], params["b3"]

    # Pad the layer-1 contraction dim 13 -> 16 with zeros (exact same math).
    x_pad = jnp.pad(x, ((0, 0), (0, K_PAD - N_OBSERVATIONS)))
    w1_pad = jnp.pad(w1, ((0, K_PAD - N_OBSERVATIONS), (0, 0)))

    grid = (HIDDEN // TK,)

    return pl.pallas_call(
        dqn_kernel,
        out_shape=jax.ShapeDtypeStruct((B, N_ACTIONS), jnp.float32),
        grid_spec=pltpu.PrefetchScalarGridSpec(
            num_scalar_prefetch=0,
            grid=grid,
            in_specs=[
                pl.BlockSpec((B, K_PAD), lambda k: (0, 0)),        # x
                pl.BlockSpec((K_PAD, HIDDEN), lambda k: (0, 0)),   # w1
                pl.BlockSpec((1, HIDDEN), lambda k: (0, 0)),       # b1
                pl.BlockSpec((HIDDEN, TK), lambda k: (0, k)),      # w2 (tiled cols)
                pl.BlockSpec((1, TK), lambda k: (0, k)),           # b2 (tiled)
                pl.BlockSpec((TK, N_ACTIONS), lambda k: (k, 0)),   # w3 (tiled rows)
                pl.BlockSpec((1, N_ACTIONS), lambda k: (0, 0)),    # b3
            ],
            out_specs=pl.BlockSpec((B, N_ACTIONS), lambda k: (0, 0)),
            scratch_shapes=[pltpu.VMEM((B, HIDDEN), jnp.float32)],  # h1
        ),
        compiler_params=pltpu.CompilerParams(
            dimension_semantics=("arbitrary",),
            vmem_limit_bytes=16 << 20,
        ),
    )(x_pad, w1_pad, b1, w2, b2, w3, b3)


def init_params(key):
    """PyTorch-style Linear init; weights stored transposed (in, out) in bf16."""
    keys = jax.random.split(key, 6)

    def linear(kw, kb, fan_in, fan_out):
        bound = 1.0 / jnp.sqrt(jnp.float32(fan_in))
        w = jax.random.uniform(kw, (fan_in, fan_out), jnp.float32, -bound, bound)
        b = jax.random.uniform(kb, (1, fan_out), jnp.float32, -bound, bound)
        return w.astype(jnp.bfloat16), b  # weights bf16, biases f32

    w1, b1 = linear(keys[0], keys[1], N_OBSERVATIONS, HIDDEN)
    w2, b2 = linear(keys[2], keys[3], HIDDEN, HIDDEN)
    w3, b3 = linear(keys[4], keys[5], HIDDEN, N_ACTIONS)
    return {"w1": w1, "b1": b1, "w2": w2, "b2": b2, "w3": w3, "b3": b3}


def dqn_reference(x, params):
    """Pure-JAX reference (f32 activations, same bf16-quantized weights)."""
    w1 = params["w1"].astype(jnp.float32)
    w2 = params["w2"].astype(jnp.float32)
    w3 = params["w3"].astype(jnp.float32)
    h1 = jnp.maximum(x @ w1 + params["b1"], 0.0)
    h2 = jnp.maximum(h1 @ w2 + params["b2"], 0.0)
    return h2 @ w3 + params["b3"]


if __name__ == "__main__":
    key = jax.random.PRNGKey(0)
    k_params, k_x = jax.random.split(key)

    params = init_params(k_params)
    B = 8  # small acting-path batch; kernel scales to B>=128 for training
    x = jax.random.uniform(k_x, (B, N_OBSERVATIONS), jnp.float32)

    out = dqn_forward(x, params)
    out = jax.block_until_ready(out)

    ref = dqn_reference(x, params)
    assert out.shape == (B, N_ACTIONS), out.shape
    # bf16 MXU inputs vs f32-activation reference -> relaxed tolerance.
    assert jnp.allclose(out, ref, atol=2e-2, rtol=2e-2), "mismatch vs reference"

    print("KERNEL_OK")
</pallas_src>

<mosaic_0001>
module attributes {stable_mosaic.version = 11 : i64} {
  func.func @dqn_kernel(%arg0: i32, %arg1: memref<8x16xf32, #tpu.memory_space<vmem>>, %arg2: memref<16x1024xbf16, #tpu.memory_space<vmem>>, %arg3: memref<1x1024xf32, #tpu.memory_space<vmem>>, %arg4: memref<1024x256xbf16, #tpu.memory_space<vmem>>, %arg5: memref<1x256xf32, #tpu.memory_space<vmem>>, %arg6: memref<256x4xbf16, #tpu.memory_space<vmem>>, %arg7: memref<1x4xf32, #tpu.memory_space<vmem>>, %arg8: memref<8x4xf32, #tpu.memory_space<vmem>>, %arg9: memref<8x1024xf32, #tpu.memory_space<vmem>>) attributes {dimension_semantics = [#tpu.dimension_semantics<arbitrary>], iteration_bounds = array<i64: 4>, scalar_prefetch = 0 : i64, scratch_operands = 1 : i64, tpu.core_type = #tpu.core_type<tc>, window_params = [{pipeline_mode = #tpu.pipeline_mode<synchronous>, transform_indices = @transform_0, window_bounds = array<i64: 8, 16>}, {pipeline_mode = #tpu.pipeline_mode<synchronous>, transform_indices = @transform_1, window_bounds = array<i64: 16, 1024>}, {pipeline_mode = #tpu.pipeline_mode<synchronous>, transform_indices = @transform_2, window_bounds = array<i64: 1, 1024>}, {transform_indices = @transform_3, window_bounds = array<i64: 1024, 256>}, {transform_indices = @transform_4, window_bounds = array<i64: 1, 256>}, {transform_indices = @transform_5, window_bounds = array<i64: 256, 4>}, {pipeline_mode = #tpu.pipeline_mode<synchronous>, transform_indices = @transform_6, window_bounds = array<i64: 1, 4>}, {pipeline_mode = #tpu.pipeline_mode<synchronous>, transform_indices = @transform_7, window_bounds = array<i64: 8, 4>}]} {
    %c0_i32 = arith.constant 0 : i32
    %0 = arith.cmpi eq, %arg0, %c0_i32 : i32
    %1 = arith.extui %0 : i1 to i32
    %c0_i32_0 = arith.constant 0 : i32
    %2 = arith.cmpi ne, %1, %c0_i32_0 : i32
    scf.if %2 {
      %c0_14 = arith.constant 0 : index
      %c0_15 = arith.constant 0 : index
      %18 = vector.load %arg1[%c0_14, %c0_15] : memref<8x16xf32, #tpu.memory_space<vmem>>, vector<8x16xf32>
      %19 = arith.truncf %18 : vector<8x16xf32> to vector<8x16xbf16>
      %c0_16 = arith.constant 0 : index
      %c0_17 = arith.constant 0 : index
      %20 = vector.load %arg2[%c0_16, %c0_17] : memref<16x1024xbf16, #tpu.memory_space<vmem>>, vector<16x1024xbf16>
      %cst_18 = arith.constant dense<0.000000e+00> : vector<8x1024xf32>
      %21 = tpu.matmul %19, %20, %cst_18 {dimension_numbers = #tpu.dot_dimension_numbers<[1], [0], [0], [1], [0, 0, 1, 1], [], []>} : vector<8x16xbf16>, vector<16x1024xbf16>, vector<8x1024xf32> -> vector<8x1024xf32>
      %c0_19 = arith.constant 0 : index
      %c0_20 = arith.constant 0 : index
      %22 = vector.load %arg3[%c0_19, %c0_20] : memref<1x1024xf32, #tpu.memory_space<vmem>>, vector<1x1024xf32>
      %23 = vector.broadcast %22 : vector<1x1024xf32> to vector<8x1024xf32>
      %24 = arith.addf %21, %23 : vector<8x1024xf32>
      %cst_21 = arith.constant 0.000000e+00 : f32
      %25 = vector.broadcast %cst_21 : f32 to vector<8x1024xf32>
      %26 = arith.maximumf %24, %25 : vector<8x1024xf32>
      %c0_22 = arith.constant 0 : index
      %c0_23 = arith.constant 0 : index
      %27 = vector.load %arg9[%c0_22, %c0_23] : memref<8x1024xf32, #tpu.memory_space<vmem>>, vector<8x1024xf32>
      tpu.vector_store %arg9[%c0_22, %c0_23], %26 {strides = array<i32>} : memref<8x1024xf32, #tpu.memory_space<vmem>>, vector<8x1024xf32>,
      %c0_24 = arith.constant 0 : index
      %c0_25 = arith.constant 0 : index
      %28 = vector.load %arg7[%c0_24, %c0_25] : memref<1x4xf32, #tpu.memory_space<vmem>>, vector<1x4xf32>
      %29 = vector.shape_cast %28 : vector<1x4xf32> to vector<1x4xf32>
      %30 = vector.broadcast %29 : vector<1x4xf32> to vector<8x4xf32>
      %c0_26 = arith.constant 0 : index
      %c0_27 = arith.constant 0 : index
      %31 = vector.load %arg8[%c0_26, %c0_27] : memref<8x4xf32, #tpu.memory_space<vmem>>, vector<8x4xf32>
      tpu.vector_store %arg8[%c0_26, %c0_27], %30 {strides = array<i32>} : memref<8x4xf32, #tpu.memory_space<vmem>>, vector<8x4xf32>,
    } else {
    }
    %c0 = arith.constant 0 : index
    %c0_1 = arith.constant 0 : index
    %3 = vector.load %arg9[%c0, %c0_1] : memref<8x1024xf32, #tpu.memory_space<vmem>>, vector<8x1024xf32>
    %4 = arith.truncf %3 : vector<8x1024xf32> to vector<8x1024xbf16>
    %c0_2 = arith.constant 0 : index
    %c0_3 = arith.constant 0 : index
    %5 = vector.load %arg4[%c0_2, %c0_3] : memref<1024x256xbf16, #tpu.memory_space<vmem>>, vector<1024x256xbf16>
    %cst = arith.constant dense<0.000000e+00> : vector<8x256xf32>
    %6 = tpu.matmul %4, %5, %cst {dimension_numbers = #tpu.dot_dimension_numbers<[1], [0], [0], [1], [0, 0, 1, 1], [], []>} : vector<8x1024xbf16>, vector<1024x256xbf16>, vector<8x256xf32> -> vector<8x256xf32>
    %c0_4 = arith.constant 0 : index
    %c0_5 = arith.constant 0 : index
    %7 = vector.load %arg5[%c0_4, %c0_5] : memref<1x256xf32, #tpu.memory_space<vmem>>, vector<1x256xf32>
    %8 = vector.broadcast %7 : vector<1x256xf32> to vector<8x256xf32>
    %9 = arith.addf %6, %8 : vector<8x256xf32>
    %cst_6 = arith.constant 0.000000e+00 : f32
    %10 = vector.broadcast %cst_6 : f32 to vector<8x256xf32>
    %11 = arith.maximumf %9, %10 : vector<8x256xf32>
    %c0_7 = arith.constant 0 : index
    %c0_8 = arith.constant 0 : index
    %12 = vector.load %arg8[%c0_7, %c0_8] : memref<8x4xf32, #tpu.memory_space<vmem>>, vector<8x4xf32>
    %13 = arith.truncf %11 : vector<8x256xf32> to vector<8x256xbf16>
    %c0_9 = arith.constant 0 : index
    %c0_10 = arith.constant 0 : index
    %14 = vector.load %arg6[%c0_9, %c0_10] : memref<256x4xbf16, #tpu.memory_space<vmem>>, vector<256x4xbf16>
    %cst_11 = arith.constant dense<0.000000e+00> : vector<8x4xf32>
    %15 = tpu.matmul %13, %14, %cst_11 {dimension_numbers = #tpu.dot_dimension_numbers<[1], [0], [0], [1], [0, 0, 1, 1], [], []>} : vector<8x256xbf16>, vector<256x4xbf16>, vector<8x4xf32> -> vector<8x4xf32>
    %16 = arith.addf %12, %15 : vector<8x4xf32>
    %c0_12 = arith.constant 0 : index
    %c0_13 = arith.constant 0 : index
    %17 = vector.load %arg8[%c0_12, %c0_13] : memref<8x4xf32, #tpu.memory_space<vmem>>, vector<8x4xf32>
    tpu.vector_store %arg8[%c0_12, %c0_13], %16 {strides = array<i32>} : memref<8x4xf32, #tpu.memory_space<vmem>>, vector<8x4xf32>,
    return
  }
  func.func @transform_0(%arg0: i32) -> (i32, i32) {
    %c0_i32 = arith.constant 0 : i32
    %c0_i32_0 = arith.constant 0 : i32
    %c0_i32_1 = arith.constant 0 : i32
    return %c0_i32, %c0_i32_0 : i32, i32
  }
  func.func @transform_1(%arg0: i32) -> (i32, i32) {
    %c0_i32 = arith.constant 0 : i32
    %c0_i32_0 = arith.constant 0 : i32
    %c0_i32_1 = arith.constant 0 : i32
    return %c0_i32, %c0_i32_0 : i32, i32
  }
  func.func @transform_2(%arg0: i32) -> (i32, i32) {
    %c0_i32 = arith.constant 0 : i32
    %c0_i32_0 = arith.constant 0 : i32
    %c0_i32_1 = arith.constant 0 : i32
    return %c0_i32, %c0_i32_0 : i32, i32
  }
  func.func @transform_3(%arg0: i32) -> (i32, i32) {
    %c0_i32 = arith.constant 0 : i32
    %c0_i32_0 = arith.constant 0 : i32
    return %c0_i32, %arg0 : i32, i32
  }
  func.func @transform_4(%arg0: i32) -> (i32, i32) {
    %c0_i32 = arith.constant 0 : i32
    %c0_i32_0 = arith.constant 0 : i32
    return %c0_i32, %arg0 : i32, i32
  }
  func.func @transform_5(%arg0: i32) -> (i32, i32) {
    %c0_i32 = arith.constant 0 : i32
    %c0_i32_0 = arith.constant 0 : i32
    return %arg0, %c0_i32 : i32, i32
  }
  func.func @transform_6(%arg0: i32) -> (i32, i32) {
    %c0_i32 = arith.constant 0 : i32
    %c0_i32_0 = arith.constant 0 : i32
    %c0_i32_1 = arith.constant 0 : i32
    return %c0_i32, %c0_i32_0 : i32, i32
  }
  func.func @transform_7(%arg0: i32) -> (i32, i32) {
    %c0_i32 = arith.constant 0 : i32
    %c0_i32_0 = arith.constant 0 : i32
    %c0_i32_1 = arith.constant 0 : i32
    return %c0_i32, %c0_i32_0 : i32, i32
  }
}

</mosaic_0001>

<bundles_post_ra>
// kernel: tpu_custom_call.1
= control target key start
LH: loop header
LB: loop body
LE: loop exit
PB: predicated region body
PF: predicated region fallthrough
CT: control target
= control target key end

     0   :  { %s3139_s0 = inlined_call_operand.hbm [shape: f32[8,16], index: 0, kind: input, shape index: {}]   ;;  %s3140_s1 = inlined_call_operand.hbm [shape: bf16[16,1024], index: 1, kind: input, shape index: {}]   ;;  %s3141_s2 = inlined_call_operand.hbm [shape: f32[1,1024], index: 2, kind: input, shape index: {}]   ;;  %s3142_s3 = inlined_call_operand.hbm [shape: bf16[1024,1024], index: 3, kind: input, shape index: {}]   ;;  %s3143_s4 = inlined_call_operand.hbm [shape: f32[1,1024], index: 4, kind: input, shape index: {}]   ;;  %s3144_s5 = inlined_call_operand.vmem [shape: bf16[1024,4], index: 5, kind: input, shape index: {}]   ;;  %s3145_s6 = inlined_call_operand.hbm [shape: f32[1,4], index: 6, kind: input, shape index: {}]   ;;  %s3146_s7 = inlined_call_operand.vmem [shape: f32[8,4], index: 7, kind: output, shape index: {}]  }
   0x1   :  { %3158 = sst [smem:[#allocation19_spill]] %s3140_s1 }
   0x2   :  { %3159 = sst [smem:[#allocation20_spill]] %s3142_s3 }
   0x3   :  { %12 = vsyncpa [#allocation4], 0 }
   0x4   :  { %13 = vsyncpa [#allocation6], 0 }
   0x5   :  { %14 = vsyncpa [#allocation9], 0 }
   0x6   :  { %16 = vsyncpa [#allocation9 + $0x1], 0 }
   0x7   :  { %17 = vsyncpa [#allocation12], 0  ;;  %s2721_s24 = smov 0   ;;  %s2723_s25 = smov 0  }
   0x8   :  { %s2725_s26 = smov 0   ;;  %s2727_s27 = smov 0  }
   0x9 LB: > { %s2740_s28 = sadd.s32 4294967295, %s2668_s27   ;;  %p106_p0 = scmp.ne.s32.totalorder %s2660_s25, %s2656_s24  ;;  %s2668_s27 = sphi %s2727_s27, %s3183_s27   ;;  %s2664_s26 = sphi %s2725_s26, %s3187_s26   ;;  %s2660_s25 = sphi %s2723_s25, %s3186_s25   ;;  %s2656_s24 = sphi %s2721_s24, %s3185_s24  }
   0xa   : > { %p3147_p1 = scmp.eq.s32.totalorder %s2740_s28, 0  ;;  %p1935_p2 = scmp.ge.s32.totalorder %s2668_s27, 1 }
   0xb   : > { %p211_p3 = scmp.lt.s32.totalorder %s2668_s27, 5  ;;  %s2670_s8 = smov [#allocation5]  }
   0xc   : > { %p2749_p5 = por %p3147_p1, %p106_p0  ;;  %s234_s9 = sshll.u32 %s2670_s8, 4  ;;  %s235_s9 = int_to_ptr.vmem [resolvable:$true] %s234_s9 }
   0xd   : > { %p2753_p6 = pnand %p1935_p2, %p211_p3  ;;  %s2766_s11 = sadd.s32 1, %s2668_s27  }
   0xe   : > { %s3160_s29 = scalar_select %p2749_p5, 1, 0 }
   0xf   : > { %s3161_s30 = scalar_select %p2753_p6, 1, 0 }
  0x10   : > { %p2172_p7 = pneg %p2753_p6  ;;  %3163 = sst [smem:[#allocation17_spill]] %s2766_s11 }
  0x11   : > { %s93_s12 = sadd.s32 1, %s2664_s26  ;;  %s90_s13 = ssub.s32 %s2668_s27, %s2766_s11 }
  0x12   : > { %p2761_p8 = pnand %p2172_p7, %p3147_p1  ;;  %s3164_s1 = sld [smem:[#allocation19_spill]] }
  0x14   : > { %s3162_s10 = scalar_select %p2761_p8, 1, 0 }
  0x15   : > { %p2779_p10 = pneg %p2761_p8 }
  0x18   : > { %s2450_s16 = scalar_lea.hbm %s3164_s1, 1024 }
  0x19   : > { %p2451_p9 = scmp.ne.s32.totalorder %s3164_s1, %s2450_s16  ;;  %p2457_p13 = scmp.lt.u32.totalorder %s2450_s16, %s3164_s1 }
  0x1b   : > { %p2453_p11 = pnand %p2779_p10, %p2451_p9 }
  0x1d   : > { %p2454_p12 = pneg %p2453_p11 }
  0x1f   : > { %p2459_p0 = pnand %p2457_p13, %p2454_p12 }
  0x21   : > { %2462 = shalt.err (!%p2459_p0)
}
  0x22   : > { %s2463_s22 = scalar_lea.vmem %s235_s9, 1024  ;;  %p2471_p4 = scmp.lt.s32.totalorder %s235_s9, %s235_s9 }
  0x23   : > { %p2464_p2 = scmp.ne.s32.totalorder %s235_s9, %s2463_s22  ;;  %p2472_p1 = scmp.lt.s32.totalorder %s2463_s22, %s2463_s22 }
  0x25   : > { %p2466_p3 = pnand %p2464_p2, %p2779_p10  ;;  %p2473_p5 = por %p2472_p1, %p2471_p4 }
  0x27   : > { %p2467_p7 = pneg %p2466_p3 }
  0x29   : > { %p2474_p6 = pnand %p2473_p5, %p2467_p7 }
  0x2b   : > { %2477 = shalt.err (!%p2474_p6)
}
  0x2c   : > { %s2671_s23 = smov 512   ;;  %s2672_s24 = smov 32  }
  0x2d   : > { %2178 = dma.hbm_to_vmem [thread:$0]  (!%p2761_p8), %s3164_s1, 1024, %s235_s9, [#allocation6], %s2671_s23, %s2671_s23, %s2672_s24  }
  0x2e   : > { %p91_p1 = scmp.eq.s32.totalorder %s90_s13, 0  ;;  %p100_p4 = scmp.ne.s32.totalorder %s2664_s26, %s2660_s25 }
  0x2f   : > { %p101_p5 = scmp.eq.s32.totalorder %s2668_s27, 0  ;;  %p2196_p6 = scmp.lt.s32.totalorder %s2668_s27, 4 }
  0x30   : > { %s2802_s15 = scalar_select %p91_p1, %s2664_s26, %s93_s12  }
  0x31   : > { %p102_p9 = por %p101_p5, %p100_p4  ;;  %s270_s16 = sand.u32 1, %s2668_s27  }
  0x32   : > { %3166 = sst [smem:[#allocation18_spill]] %s2802_s15  ;;  %s3154_s17 = sand.u32 1, %s2664_s26  }
  0x33   : > { %s1941_s18 = sshll.u32 %s3154_s17, 10  ;;  %s2116_s20 = sshll.u32 %s2668_s27, 7 }
  0x34   : > { %s3167_s3 = sld [smem:[#allocation20_spill]]  ;;  %s274_s9 = scalar_lea.vmem [#allocation8], %s1941_s18 }
  0x35   : > { %s281_s13 = sshll.u32 %s274_s9, 4  ;;  %p2814_p11 = pnand %p2196_p6, %p102_p9  ;;  %s2818_s13 = int_to_ptr.vmem [resolvable:$true] %s281_s13 }
  0x36   : > { %s2820_s24 = scalar_lea.sflag [#allocation9], %s270_s16 }
  0x37   : > { %s3168_s12 = scalar_select %p2814_p11, 1, 0 }
  0x38   : > { %p3155_p13 = pneg %p2814_p11 }
  0x3a   : > { %s2812_s11 = scalar_lea.hbm %s3167_s3, %s2116_s20  ;;  %s2483_s20 = scalar_lea.hbm %s3167_s3, 65536 }
  0x3b   : > { %s2478_s8 = scalar_lea.hbm %s2812_s11, 16384  ;;  %p2484_p3 = scmp.lt.u32.totalorder %s2812_s11, %s3167_s3 }
  0x3c   : > { %p2479_p12 = scmp.ne.s32.totalorder %s2812_s11, %s2478_s8  ;;  %p2485_p7 = scmp.lt.u32.totalorder %s2483_s20, %s2478_s8 }
  0x3d   : > { %p2487_p4 = scmp.lt.u32.totalorder %s2478_s8, %s2812_s11 }
  0x3e   : > { %p2481_p0 = pnand %p3155_p13, %p2479_p12  ;;  %p2486_p1 = por %p2485_p7, %p2484_p3 }
  0x40   : > { %p2482_p2 = pneg %p2481_p0  ;;  %p2488_p5 = por %p2487_p4, %p2486_p1 }
  0x42   : > { %p2489_p6 = pnand %p2488_p5, %p2482_p2 }
  0x44   : > { %2492 = shalt.err (!%p2489_p6)
}
  0x45   : > { %s2493_s16 = scalar_lea.vmem %s2818_s13, 16384  ;;  %s2673_s9 = smov [#allocation8]  }
  0x46   : > { %p2494_p9 = scmp.ne.s32.totalorder %s2818_s13, %s2493_s16  ;;  %s2498_s14 = sshll.u32 %s2673_s9, 4  ;;  %s2499_s14 = int_to_ptr.vmem [resolvable:$false] %s2498_s14 }
  0x47   : > { %s2500_s18 = scalar_lea.vmem %s2499_s14, 32768  ;;  %p2501_p8 = scmp.lt.s32.totalorder %s2818_s13, %s2499_s14 }
  0x48   : > { %p2496_p12 = pnand %p2494_p9, %p3155_p13  ;;  %p2502_p3 = scmp.lt.s32.totalorder %s2500_s18, %s2493_s16 }
  0x4a   : > { %p2497_p0 = pneg %p2496_p12  ;;  %p2503_p7 = por %p2502_p3, %p2501_p8 }
  0x4c   : > { %p2504_p1 = pnand %p2503_p7, %p2497_p0 }
  0x4e   : > { %2507 = shalt.err (!%p2504_p1)
}
  0x4f   : > { %s2674_s8 = smov 128   ;;  %s2675_s20 = smov 8  }
  0x50   : > { %2188 = dma.hbm_to_vmem [thread:$0]  (!%p2814_p11), %s2812_s11, 16384, %s2818_s13, %s2820_s24, %s2671_s23, %s2674_s8, %s2675_s20  }
  0x51   : > { %s2676_s21 = smov [#allocation3]   ;;  %s2677_s9 = smov [#allocation7]  }
  0x52   : > { %s224_s22 = sshll.u32 %s2676_s21, 4  ;;  %s248_s17 = sshll.u32 %s2677_s9, 4  ;;  %s225_s22 = int_to_ptr.vmem [resolvable:$true] %s224_s22  ;;  %s2849_s17 = int_to_ptr.vmem [resolvable:$true] %s248_s17 }
  0x53   : > { %s2508_s18 = scalar_lea.hbm %s3139_s0, 128 }
  0x54   : > { %p2509_p8 = scmp.ne.s32.totalorder %s3139_s0, %s2508_s18  ;;  %p2515_p5 = scmp.lt.u32.totalorder %s2508_s18, %s3139_s0 }
  0x56   : > { %p2511_p2 = pnand %p2509_p8, %p2779_p10 }
  0x58   : > { %p2512_p4 = pneg %p2511_p2 }
  0x5a   : > { %p2517_p6 = pnand %p2515_p5, %p2512_p4 }
  0x5c   : > { %2520 = shalt.err (!%p2517_p6)
}
  0x5d   : > { %s2521_s23 = scalar_lea.vmem %s225_s22, 128  ;;  %p2529_p3 = scmp.lt.s32.totalorder %s225_s22, %s225_s22 }
  0x5e   : > { %p2522_p9 = scmp.ne.s32.totalorder %s225_s22, %s2521_s23  ;;  %p2530_p7 = scmp.lt.s32.totalorder %s2521_s23, %s2521_s23 }
  0x60   : > { %p2524_p12 = pnand %p2522_p9, %p2779_p10  ;;  %p2531_p1 = por %p2530_p7, %p2529_p3 }
  0x62   : > { %p2525_p0 = pneg %p2524_p12 }
  0x64   : > { %p2532_p13 = pnand %p2531_p1, %p2525_p0 }
  0x66   : > { %2535 = shalt.err (!%p2532_p13)
}
  0x67   : > { %p3169_p8 = scmp.ne.s32.totalorder %s3162_s10, 0  ;;  %s2536_s8 = scalar_lea.hbm %s3141_s2, 128 }
  0x68   : > { %p2537_p2 = scmp.ne.s32.totalorder %s3141_s2, %s2536_s8  ;;  %p2543_p13 = scmp.lt.u32.totalorder %s2536_s8, %s3141_s2 }
  0x69   : > { %2175 = dma.hbm_to_vmem [thread:$0]  (!%p3169_p8), %s3139_s0, 128, %s225_s22, [#allocation4]  }
  0x6a   : > { %p2539_p4 = pnand %p2537_p2, %p2779_p10 }
  0x6c   : > { %p2540_p5 = pneg %p2539_p4 }
  0x6e   : > { %p2545_p6 = pnand %p2543_p13, %p2540_p5 }
  0x70   : > { %2548 = shalt.err (!%p2545_p6)
}
  0x71   : > { %s2549_s22 = scalar_lea.vmem %s2849_s17, 128  ;;  %p2557_p3 = scmp.lt.s32.totalorder %s2849_s17, %s2849_s17 }
  0x72   : > { %p2550_p9 = scmp.ne.s32.totalorder %s2849_s17, %s2549_s22  ;;  %p2558_p7 = scmp.lt.s32.totalorder %s2549_s22, %s2549_s22 }
  0x74   : > { %p2552_p12 = pnand %p2550_p9, %p2779_p10  ;;  %p2559_p1 = por %p2558_p7, %p2557_p3 }
  0x76   : > { %p2553_p0 = pneg %p2552_p12 }
  0x78   : > { %p2560_p2 = pnand %p2559_p1, %p2553_p0 }
  0x7a   : > { %2563 = shalt.err (!%p2560_p2)
}
  0x7b   : > { %2181 = dma.hbm_to_vmem [thread:$0]  (!%p3169_p8), %s3141_s2, 128, %s2849_s17, [#allocation6]  }
  0x7c   : > { %s3170_s11 = sand.u32 1, %s2664_s26   ;;  %s2678_s1 = smov [#allocation11]  }
  0x7d   : > { %s1944_s23 = sshll.u32 %s3170_s11, 1  ;;  %s259_s3 = sshll.u32 %s2678_s1, 4  ;;  %s260_s3 = int_to_ptr.vmem [resolvable:$true] %s259_s3 }
  0x7e   : > { %s2117_s15 = sshll.u32 %s2668_s27, 5  ;;  %s2564_s20 = scalar_lea.hbm %s3145_s6, 16 }
  0x7f   : > { %p2565_p4 = scmp.ne.s32.totalorder %s3145_s6, %s2564_s20  ;;  %p2571_p6 = scmp.lt.u32.totalorder %s2564_s20, %s3145_s6 }
  0x81   : > { %p2567_p5 = pnand %p2565_p4, %p2779_p10 }
  0x83   : > { %p2568_p13 = pneg %p2567_p5 }
  0x85   : > { %p2573_p9 = pnand %p2571_p6, %p2568_p13 }
  0x87   : > { %2576 = shalt.err (!%p2573_p9)
}
  0x88   : > { %s2577_s17 = scalar_lea.vmem %s260_s3, 16  ;;  %s2584_s27 = scalar_lea.vmem %s260_s3, 32 }
  0x89   : > { %p2578_p12 = scmp.ne.s32.totalorder %s260_s3, %s2577_s17  ;;  %p2585_p7 = scmp.lt.s32.totalorder %s260_s3, %s260_s3 }
  0x8a   : > { %p2586_p1 = scmp.lt.s32.totalorder %s2584_s27, %s2577_s17 }
  0x8b   : > { %p2580_p0 = pnand %p2578_p12, %p2779_p10 }
  0x8c   : > { %p2587_p2 = por %p2586_p1, %p2585_p7 }
  0x8d   : > { %p2581_p3 = pneg %p2580_p0 }
  0x8f   : > { %p2588_p11 = pnand %p2587_p2, %p2581_p3 }
  0x91   : > { %2591 = shalt.err (!%p2588_p11)
}
  0x92   : > { %2184 = dma.hbm_to_vmem [thread:$0]  (!%p3169_p8), %s3145_s6, 16, %s260_s3, [#allocation12]  }
  0x93   : > { %s2916_s13 = scalar_lea.hbm %s3143_s4, %s2117_s15  ;;  %s295_s19 = scalar_lea.vmem [#allocation10], %s1944_s23 }
  0x94   : > { %s303_s8 = sshll.u32 %s295_s19, 4  ;;  %s2592_s20 = scalar_lea.hbm %s2916_s13, 32  ;;  %s304_s8 = int_to_ptr.vmem [resolvable:$true] %s303_s8 }
  0x95   : > { %p2593_p10 = scmp.ne.s32.totalorder %s2916_s13, %s2592_s20  ;;  %p3171_p11 = scmp.ne.s32.totalorder %s3168_s12, 0 }
  0x96   : > { %s2597_s21 = scalar_lea.hbm %s3143_s4, 128  ;;  %p2598_p8 = scmp.lt.u32.totalorder %s2916_s13, %s3143_s4 }
  0x97   : > { %p3172_p4 = pneg %p3171_p11  ;;  %p2599_p6 = scmp.lt.u32.totalorder %s2597_s21, %s2592_s20 }
  0x98   : > { %p2601_p12 = scmp.lt.u32.totalorder %s2592_s20, %s2916_s13 }
  0x99   : > { %p2595_p5 = pnand %p2593_p10, %p3172_p4  ;;  %p2600_p9 = por %p2599_p6, %p2598_p8 }
  0x9b   : > { %p2596_p13 = pneg %p2595_p5  ;;  %p2602_p0 = por %p2601_p12, %p2600_p9 }
  0x9d   : > { %p2603_p3 = pnand %p2602_p0, %p2596_p13 }
  0x9f   : > { %2606 = shalt.err (!%p2603_p3)
}
  0xa0   : > { %s2607_s23 = scalar_lea.vmem %s304_s8, 32  ;;  %p3173_p1 = pmov %p3172_p4 }
  0xa1   : > { %p2608_p7 = scmp.ne.s32.totalorder %s304_s8, %s2607_s23  ;;  %s2679_s16 = smov [#allocation10]  }
  0xa2   : > { %s2612_s22 = sshll.u32 %s2679_s16, 4  ;;  %s2613_s22 = int_to_ptr.vmem [resolvable:$false] %s2612_s22 }
  0xa3   : > { %p2610_p2 = pnand %p2608_p7, %p3173_p1  ;;  %s2614_s17 = scalar_lea.vmem %s2613_s22, 64 }
  0xa4   : > { %p2615_p4 = scmp.lt.s32.totalorder %s304_s8, %s2613_s22  ;;  %p2616_p5 = scmp.lt.s32.totalorder %s2614_s17, %s2607_s23 }
  0xa5   : > { %p2611_p10 = pneg %p2610_p2 }
  0xa6   : > { %p2617_p6 = por %p2616_p5, %p2615_p4 }
  0xa8   : > { %p2618_p8 = pnand %p2617_p6, %p2611_p10 }
  0xaa   : > { %2621 = shalt.err (!%p2618_p8)
}
  0xab   : > { %2191 = dma.hbm_to_vmem [thread:$0]  (!%p3171_p11), %s2916_s13, 32, %s304_s8, %s2820_s24  }
  0xac   : > { %p3174_p13 = scmp.ne.s32.totalorder %s3161_s30, 0 }
  0xad   : > { %p3175_p9 = scmp.eq.s32.totalorder (!%p3174_p13), %s2740_s28, 0 }
  0xae   : > { %321 = sbr.rel (%p3174_p13) target bundleno = 997 (0x3e5), region = 48 }
  0xb5   : > { %2639 = dma.done.wait (%p3175_p9), [#allocation4], 128   ;;  %p3176_p12 = pmov %p3175_p9 }
  0xb6   : > { %p3177_p0 = pmov %p3175_p9 }
  0xb7   : > { %2641 = vsyncadd (%p3176_p12), [#allocation4], 4294967168 }
  0xb8   : > { %2643 = dma.done.wait (%p3177_p0), [#allocation6], 1152   ;;  %p3178_p3 = pmov %p3177_p0 }
  0xb9   : > { %s335_s12 = sand.u32 1, %s2740_s28   ;;  %s337_s24 = sand.u32 1, %s2660_s25  }
  0xba   : > { %2645 = vsyncadd (%p3178_p3), [#allocation6], 4294966144  ;;  %s1951_s27 = sshll.u32 %s337_s24, 10  ;;  %s336_s30 = scalar_lea.sflag [#allocation9], %s335_s12 }
  0xbb   : > { %s2950_s14 = scalar_lea.vmem [#allocation8], %s1951_s27  ;;  %p3179_p11 = scmp.ne.s32.totalorder %s3160_s29, 0 }
  0xbd   : > { %2647 = dma.done.wait (%p3179_p11), %s336_s30, 16416  }
  0xbe   : > { %2649 = vsyncadd (%p3179_p11), %s336_s30, 4294950880  ;;  %s2956_s18 = sshll.u32 %s337_s24, 1  ;;  %p3180_p7 = pmov %p3177_p0 }
  0xbf   : > { %s348_s11 = scalar_lea.vmem [#allocation10], %s2956_s18 }
  0xc0   : > { %2651 = dma.done.wait (%p3180_p7), [#allocation12], 16   ;;  %p3181_p1 = pmov %p3177_p0 }
  0xc1   : > { %s1954_s1 = sshll.u32 %s2740_s28, 5  ;;  %p3182_p10 = scmp.ne.s32.totalorder %s2740_s28, 0 }
  0xc2   : > { %2653 = vsyncadd (%p3181_p1), [#allocation12], 4294967280  ;;  %p391_p2 = scmp.lt.s32.totalorder %s1954_s1, 127  ;;  %v403_v0 = vld [vmem:[#allocation5] sm:$0xff] (!%p3182_p10)  ;;  %v404_v2 = vld [vmem:[#allocation5 + $0x8] sm:$0xff] (!%p3182_p10)  ;;  %v2680_v6 = vmov (!%p3182_p10), 0   ;;  %v413_v20 = vlaneseq (!%p3182_p10) }
  0xc3   : > { %400 = sbr.rel (%p3182_p10) target bundleno = 428 (0x1ac), region = 76  ;;  %v407_v1 = vld [vmem:[#allocation5 + $0x20] sm:$0xff] (!%p3182_p10)  ;;  %v408_v4 = vld [vmem:[#allocation5 + $0x28] sm:$0xff] (!%p3182_p10)  ;;  %529 = vmatprep.mubr.bf16.mxu0 (!%p3182_p10), %v2680_v6  ;;  %570 = vmatprep.mubr.bf16.mxu1 (!%p3182_p10), %v2680_v6  ;;  %v401_v7 = vld [vmem:[#allocation3] sm:$0xff] (!%p3182_p10)  ;;  %vm493_vm0 = vcmask (!%p3182_p10), 130048   ;;  %vm684_vm1 = vcmask (!%p3182_p10), 31744  }
  0xc4   : > { %s3189_s1 = smov (!%p391_p2, %s1954_s1), 127  ;;  %v1958_v3 = vcombine.high (!%p3182_p10), %v403_v0, %v407_v1  ;;  %v1957_v5 = vcombine.low (!%p3182_p10), %v403_v0, %v407_v1  ;;  %v405_v8 = vld [vmem:[#allocation5 + $0x10] sm:$0xff] (!%p3182_p10)  ;;  %v1960_v9 = vcombine.high (!%p3182_p10), %v404_v2, %v408_v4  ;;  %v1959_v10 = vcombine.low (!%p3182_p10), %v404_v2, %v408_v4  ;;  %v406_v12 = vld [vmem:[#allocation5 + $0x18] sm:$0xff] (!%p3182_p10)  ;;  %v1969_v19 = vld [vmem:[#allocation11] ss:$0 sm:$0xff] (!%p3182_p10) }
  0xc5   : > { %s1955_s13 = sshll.u32 %s3189_s1, 2  ;;  %v409_v11 = vld [vmem:[#allocation5 + $0x30] sm:$0xff] (!%p3182_p10)  ;;  %v410_v13 = vld [vmem:[#allocation5 + $0x38] sm:$0xff] (!%p3182_p10)  ;;  %v402_v14 = vpack.c.bf16 (!%p3182_p10), %v401_v7, %v401_v7  ;;  %685 = vst.msk [vmem:[%s3146_s7] sm:$0xff] (!%p3182_p10), %vm684_vm1, %v1969_v19  ;;  %v414_v21 = vshrl.u32 (!%p3182_p10), %v413_v20, 7  ;;  %v411_v23 = vld [vmem:[#allocation7] sm:$0xff] (!%p3182_p10) }
  0xc6   : > { %s2967_s29 = scalar_lea.vmem %s3144_s5, %s1955_s13  ;;  %497 = vmatprep.subr.bf16.mxu0 (!%p3182_p10), %v1958_v3  ;;  %v1962_v15 = vcombine.high (!%p3182_p10), %v405_v8, %v409_v11  ;;  %v1964_v16 = vcombine.high (!%p3182_p10), %v406_v12, %v410_v13  ;;  %538 = vmatprep.subr.bf16.mxu1 (!%p3182_p10), %v1960_v9  ;;  %v1961_v17 = vcombine.low (!%p3182_p10), %v405_v8, %v409_v11 }
  0xc7   : > { %498 = vmatpush1.bf16.msra.mxu0 (!%p3182_p10), %v1957_v5  ;;  %539 = vmatpush1.bf16.msra.mxu1 (!%p3182_p10), %v1959_v10  ;;  %v1963_v18 = vcombine.low (!%p3182_p10), %v406_v12, %v410_v13  ;;  %v415_v22 = vsub.s32 (!%p3182_p10), 0, %v414_v21  ;;  %v423_v24 = vsub.s32 (!%p3182_p10), 2, %v414_v21  ;;  %v419_v25 = vsub.s32 (!%p3182_p10), 1, %v414_v21 }
  0xc8   : > { %579 = vmatprep.subr.bf16.mxu0 (!%p3182_p10), %v1962_v15  ;;  %620 = vmatprep.subr.bf16.mxu1 (!%p3182_p10), %v1964_v16  ;;  %v427_v26 = vsub.s32 (!%p3182_p10), 3, %v414_v21  ;;  %v431_v35 = vsub.s32 (!%p3182_p10), 4, %v414_v21  ;;  %v439_v40 = vsub.s32 (!%p3182_p10), 6, %v414_v21  ;;  %v435_v41 = vsub.s32 (!%p3182_p10), 5, %v414_v21 }
  0xc9   : > { %v416_v27 = vrot.slane (!%p3182_p10), %v411_v23, %v415_v22  ;;  %v424_v28 = vrot.slane (!%p3182_p10), %v411_v23, %v423_v24  ;;  %v420_v29 = vrot.slane (!%p3182_p10), %v411_v23, %v419_v25  ;;  %v443_v46 = vsub.s32 (!%p3182_p10), 7, %v414_v21 }
  0xca   : > { %1965 = vmatmul.mubr.msk.bf16.vlgmr.msra.gmra.mrb[0].mxu0 %vm493_vm0, %v402_v14  ;;  %1966 = vmatmul.mubr.msk.bf16.vlgmr.msra.gmra.mrb[0].mxu1 %vm493_vm0, %v402_v14  ;;  %v428_v30 = vrot.slane %v411_v23, %v427_v26  ;;  %v432_v51 = vrot.slane %v411_v23, %v431_v35  ;;  %v440_v52 = vrot.slane %v411_v23, %v439_v40 }
  0xcb   : > { %580 = vmatpush1.bf16.msra.mxu0 %v1961_v17  ;;  %621 = vmatpush1.bf16.msra.mxu1 %v1963_v18  ;;  %v436_v53 = vrot.slane %v411_v23, %v435_v41  ;;  %v444_v54 = vrot.slane %v411_v23, %v443_v46 }
  0xcc   : > { %611 = vmatprep.mubr.bf16.mxu0 %v2680_v6  ;;  %652 = vmatprep.mubr.bf16.mxu1 %v2680_v6 }
  0xd2   : > { %1967 = vmatmul.mubr.msk.bf16.vlgmr.msra.gmra.mrb[4].mxu0 %vm493_vm0, %v402_v14  ;;  %1968 = vmatmul.mubr.msk.bf16.vlgmr.msra.gmra.mrb[4].mxu1 %vm493_vm0, %v402_v14 }
 0x19d   : > { %v531_v31 = vpop.f32.mrb[0].mxu0  ;;  %v572_v33 = vpop.f32.mrb[0].mxu1 }
 0x19e   : > { %v532_v32 = vadd.f32 %v531_v31, %v416_v27  ;;  %v533_v34 = vpop.f32.mrb[1].mxu0  ;;  %v573_v36 = vadd.f32 %v572_v33, %v424_v28  ;;  %v574_v38 = vpop.f32.mrb[1].mxu1 }
 0x19f   : > { %v534_v37 = vadd.f32 %v533_v34, %v420_v29  ;;  %v535_v39 = vpop.f32.mrb[2].mxu0  ;;  %v575_v43 = vadd.f32 %v574_v38, %v428_v30  ;;  %v576_v44 = vpop.f32.mrb[2].mxu1 }
 0x1a0   : > { %v661_v42 = vmax.f32 %v532_v32, 0.0  ;;  %v536_v45 = vpop.f32.mrb[3].mxu0  ;;  %v663_v47 = vmax.f32 %v573_v36, 0.0  ;;  %v577_v49 = vpop.f32.mrb[3].mxu1 }
 0x1a1   : > { %v662_v48 = vmax.f32 %v534_v37, 0.0  ;;  %v664_v50 = vmax.f32 %v575_v43, 0.0 }
 0x1a2   : > { %669 = vst [vmem:[#allocation2] sm:$0xff] %v661_v42  ;;  %671 = vst [vmem:[#allocation2 + $0x10] sm:$0xff] %v663_v47 }
 0x1a3   : > { %670 = vst [vmem:[#allocation2 + $0x8] sm:$0xff] %v662_v48  ;;  %672 = vst [vmem:[#allocation2 + $0x18] sm:$0xff] %v664_v50 }
 0x1a5   : > { %v613_v55 = vpop.f32.mrb[4].mxu0  ;;  %v654_v57 = vpop.f32.mrb[4].mxu1 }
 0x1a6   : > { %v614_v56 = vadd.f32 %v613_v55, %v432_v51  ;;  %v615_v58 = vpop.f32.mrb[5].mxu0  ;;  %v655_v59 = vadd.f32 %v654_v57, %v440_v52  ;;  %v656_v61 = vpop.f32.mrb[5].mxu1 }
 0x1a7   : > { %v616_v60 = vadd.f32 %v615_v58, %v436_v53  ;;  %v617_v62 = vpop.f32.mrb[6].mxu0  ;;  %v657_v0 = vadd.f32 %v656_v61, %v444_v54  ;;  %v658_v1 = vpop.f32.mrb[6].mxu1 }
 0x1a8   : > { %v665_v63 = vmax.f32 %v614_v56, 0.0  ;;  %v618_v2 = vpop.f32.mrb[7].mxu0  ;;  %v667_v3 = vmax.f32 %v655_v59, 0.0  ;;  %v659_v5 = vpop.f32.mrb[7].mxu1 }
 0x1a9   : > { %v666_v4 = vmax.f32 %v616_v60, 0.0  ;;  %v668_v6 = vmax.f32 %v657_v0, 0.0 }
 0x1aa   : > { %673 = vst [vmem:[#allocation2 + $0x20] sm:$0xff] %v665_v63  ;;  %675 = vst [vmem:[#allocation2 + $0x30] sm:$0xff] %v667_v3 }
 0x1ab   : > { %674 = vst [vmem:[#allocation2 + $0x28] sm:$0xff] %v666_v4  ;;  %676 = vst [vmem:[#allocation2 + $0x38] sm:$0xff] %v668_v6 }
 0x1ac PF: > { %v2242_v7 = vld [vmem:[%s2950_s14 + $0x4] ss:$8 sps:$4 sm:$0xff]   ;;  %v2246_v9 = vld [vmem:[%s2950_s14] ss:$8 sps:$4 sm:$0xff]   ;;  %v2248_v11 = vld [vmem:[%s2950_s14 + $0x14] ss:$8 sps:$4 sm:$0xff]  }
 0x1ad   : > { %v2244_v8 = vld [vmem:[%s2950_s14 + $0x204] ss:$8 sps:$4 sm:$0xff]   ;;  %1482 = vmatprep.subr.bf16.mxu1 %v2242_v7  ;;  %v2247_v10 = vld [vmem:[%s2950_s14 + $0x200] ss:$8 sps:$4 sm:$0xff]   ;;  %v2250_v12 = vld [vmem:[%s2950_s14 + $0x214] ss:$8 sps:$4 sm:$0xff]  }
 0x1ae   : > { %1564 = vmatprep.subr.bf16.mxu0 %v2244_v8  ;;  %1483 = vmatpush1.bf16.msra.mxu1 %v2246_v9  ;;  %v2252_v13 = vld [vmem:[%s2950_s14 + $0x10] ss:$8 sps:$4 sm:$0xff]   ;;  %v2254_v15 = vld [vmem:[%s2950_s14 + $0x24] ss:$8 sps:$4 sm:$0xff]   ;;  %v2258_v17 = vld [vmem:[%s2950_s14 + $0x20] ss:$8 sps:$4 sm:$0xff]  }
 0x1af   : > { %1565 = vmatpush1.bf16.msra.mxu0 %v2247_v10  ;;  %1484 = vmatprep.subr.bf16.mxu1 %v2248_v11  ;;  %v2253_v14 = vld [vmem:[%s2950_s14 + $0x210] ss:$8 sps:$4 sm:$0xff]   ;;  %v2256_v16 = vld [vmem:[%s2950_s14 + $0x224] ss:$8 sps:$4 sm:$0xff]   ;;  %v2259_v18 = vld [vmem:[%s2950_s14 + $0x220] ss:$8 sps:$4 sm:$0xff]  }
 0x1b0   : > { %1566 = vmatprep.subr.bf16.mxu0 %v2250_v12  ;;  %v2260_v19 = vld [vmem:[%s2950_s14 + $0x34] ss:$8 sps:$4 sm:$0xff]   ;;  %v2264_v21 = vld [vmem:[%s2950_s14 + $0x30] ss:$8 sps:$4 sm:$0xff]   ;;  %v2266_v23 = vld [vmem:[%s2950_s14 + $0x44] ss:$8 sps:$4 sm:$0xff]  }
 0x1b1   : > { %v2262_v20 = vld [vmem:[%s2950_s14 + $0x234] ss:$8 sps:$4 sm:$0xff]   ;;  %v2265_v22 = vld [vmem:[%s2950_s14 + $0x230] ss:$8 sps:$4 sm:$0xff]   ;;  %v2268_v24 = vld [vmem:[%s2950_s14 + $0x244] ss:$8 sps:$4 sm:$0xff]  }
 0x1b2   : > { %1485 = vmatpush1.bf16.msra.mxu1 %v2252_v13  ;;  %v2270_v25 = vld [vmem:[%s2950_s14 + $0x40] ss:$8 sps:$4 sm:$0xff]   ;;  %v2272_v27 = vld [vmem:[%s2950_s14 + $0x54] ss:$8 sps:$4 sm:$0xff]   ;;  %v2276_v29 = vld [vmem:[%s2950_s14 + $0x50] ss:$8 sps:$4 sm:$0xff]  }
 0x1b3   : > { %1567 = vmatpush1.bf16.msra.mxu0 %v2253_v14  ;;  %1486 = vmatprep.subr.bf16.mxu1 %v2254_v15  ;;  %v2271_v26 = vld [vmem:[%s2950_s14 + $0x240] ss:$8 sps:$4 sm:$0xff]   ;;  %v2274_v28 = vld [vmem:[%s2950_s14 + $0x254] ss:$8 sps:$4 sm:$0xff]   ;;  %v2277_v30 = vld [vmem:[%s2950_s14 + $0x250] ss:$8 sps:$4 sm:$0xff]  }
 0x1b4   : > { %1568 = vmatprep.subr.bf16.mxu0 %v2256_v16  ;;  %v2278_v31 = vld [vmem:[%s2950_s14 + $0x64] ss:$8 sps:$4 sm:$0xff]   ;;  %v2282_v33 = vld [vmem:[%s2950_s14 + $0x60] ss:$8 sps:$4 sm:$0xff]   ;;  %v2284_v35 = vld [vmem:[%s2950_s14 + $0x74] ss:$8 sps:$4 sm:$0xff]  }
 0x1b5   : > { %v2280_v32 = vld [vmem:[%s2950_s14 + $0x264] ss:$8 sps:$4 sm:$0xff]   ;;  %v2283_v34 = vld [vmem:[%s2950_s14 + $0x260] ss:$8 sps:$4 sm:$0xff]   ;;  %v2286_v36 = vld [vmem:[%s2950_s14 + $0x274] ss:$8 sps:$4 sm:$0xff]  }
 0x1b6   : > { %1487 = vmatpush1.bf16.msra.mxu1 %v2258_v17  ;;  %v2288_v37 = vld [vmem:[%s2950_s14 + $0x70] ss:$8 sps:$4 sm:$0xff]   ;;  %v2290_v39 = vld [vmem:[%s2950_s14 + $0x84] ss:$8 sps:$4 sm:$0xff]   ;;  %v2294_v41 = vld [vmem:[%s2950_s14 + $0x80] ss:$8 sps:$4 sm:$0xff]  }
 0x1b7   : > { %1569 = vmatpush1.bf16.msra.mxu0 %v2259_v18  ;;  %1488 = vmatprep.subr.bf16.mxu1 %v2260_v19  ;;  %v2289_v38 = vld [vmem:[%s2950_s14 + $0x270] ss:$8 sps:$4 sm:$0xff]   ;;  %v2292_v40 = vld [vmem:[%s2950_s14 + $0x284] ss:$8 sps:$4 sm:$0xff]   ;;  %v2295_v42 = vld [vmem:[%s2950_s14 + $0x280] ss:$8 sps:$4 sm:$0xff]  }
 0x1b8   : > { %1570 = vmatprep.subr.bf16.mxu0 %v2262_v20  ;;  %v2296_v43 = vld [vmem:[%s2950_s14 + $0x94] ss:$8 sps:$4 sm:$0xff]   ;;  %v2300_v45 = vld [vmem:[%s2950_s14 + $0x90] ss:$8 sps:$4 sm:$0xff]   ;;  %v2302_v47 = vld [vmem:[%s2950_s14 + $0xa4] ss:$8 sps:$4 sm:$0xff]  }
 0x1b9   : > { %v2298_v44 = vld [vmem:[%s2950_s14 + $0x294] ss:$8 sps:$4 sm:$0xff]   ;;  %v2301_v46 = vld [vmem:[%s2950_s14 + $0x290] ss:$8 sps:$4 sm:$0xff]   ;;  %v2304_v48 = vld [vmem:[%s2950_s14 + $0x2a4] ss:$8 sps:$4 sm:$0xff]  }
 0x1ba   : > { %1489 = vmatpush1.bf16.msra.mxu1 %v2264_v21  ;;  %v2306_v49 = vld [vmem:[%s2950_s14 + $0xa0] ss:$8 sps:$4 sm:$0xff]   ;;  %v2308_v51 = vld [vmem:[%s2950_s14 + $0xb4] ss:$8 sps:$4 sm:$0xff]   ;;  %v2312_v54 = vld [vmem:[%s2950_s14 + $0xb0] ss:$8 sps:$4 sm:$0xff]  }
 0x1bb   : > { %1571 = vmatpush1.bf16.msra.mxu0 %v2265_v22  ;;  %1490 = vmatprep.subr.bf16.mxu1 %v2266_v23  ;;  %v2307_v50 = vld [vmem:[%s2950_s14 + $0x2a0] ss:$8 sps:$4 sm:$0xff]   ;;  %v2310_v52 = vld [vmem:[%s2950_s14 + $0x2b4] ss:$8 sps:$4 sm:$0xff]   ;;  %v2313_v56 = vld [vmem:[%s2950_s14 + $0x2b0] ss:$8 sps:$4 sm:$0xff]  }
 0x1bc   : > { %1572 = vmatprep.subr.bf16.mxu0 %v2268_v24  ;;  %v687_v53 = vld [vmem:[#allocation2 + $0x8] sm:$0xff]  ;;  %v2314_v58 = vld [vmem:[%s2950_s14 + $0xc4] ss:$8 sps:$4 sm:$0xff]   ;;  %v2318_v61 = vld [vmem:[%s2950_s14 + $0xc0] ss:$8 sps:$4 sm:$0xff]   ;;  %vm1820_vm2 = vcmask 31744  }
 0x1bd   : > { %v695_v55 = vpack.c.bf16 %v687_v53, %v687_v53  ;;  %v691_v57 = vld [vmem:[#allocation2 + $0x28] sm:$0xff]  ;;  %v2316_v59 = vld [vmem:[%s2950_s14 + $0x2c4] ss:$8 sps:$4 sm:$0xff]   ;;  %v2319_v62 = vld [vmem:[%s2950_s14 + $0x2c0] ss:$8 sps:$4 sm:$0xff]  }
 0x1be   : > { %1491 = vmatpush1.bf16.msra.mxu1 %v2270_v25  ;;  %v699_v60 = vpack.c.bf16 %v691_v57, %v691_v57  ;;  %v2320_v63 = vld [vmem:[%s2950_s14 + $0xd4] ss:$8 sps:$4 sm:$0xff]   ;;  %v2324_v1 = vld [vmem:[%s2950_s14 + $0xd0] ss:$8 sps:$4 sm:$0xff]   ;;  %v2326_v3 = vld [vmem:[%s2950_s14 + $0xe4] ss:$8 sps:$4 sm:$0xff]  }
 0x1bf   : > { %1573 = vmatpush1.bf16.msra.mxu0 %v2271_v26  ;;  %1492 = vmatprep.subr.bf16.mxu1 %v2272_v27  ;;  %v2322_v0 = vld [vmem:[%s2950_s14 + $0x2d4] ss:$8 sps:$4 sm:$0xff]   ;;  %v2325_v2 = vld [vmem:[%s2950_s14 + $0x2d0] ss:$8 sps:$4 sm:$0xff]   ;;  %v2328_v4 = vld [vmem:[%s2950_s14 + $0x2e4] ss:$8 sps:$4 sm:$0xff]  }
 0x1c0   : > { %1574 = vmatprep.subr.bf16.mxu0 %v2274_v28  ;;  %1514 = vmatprep.mubr.bf16.mxu1 %v695_v55  ;;  %v2330_v5 = vld [vmem:[%s2950_s14 + $0xe0] ss:$8 sps:$4 sm:$0xff]   ;;  %v2332_v7 = vld [vmem:[%s2950_s14 + $0xf4] ss:$8 sps:$4 sm:$0xff]   ;;  %v2336_v9 = vld [vmem:[%s2950_s14 + $0xf0] ss:$8 sps:$4 sm:$0xff]  }
 0x1c1   : > { %1596 = vmatprep.mubr.bf16.mxu0 %v699_v60  ;;  %v2331_v6 = vld [vmem:[%s2950_s14 + $0x2e0] ss:$8 sps:$4 sm:$0xff]   ;;  %v2334_v8 = vld [vmem:[%s2950_s14 + $0x2f4] ss:$8 sps:$4 sm:$0xff]   ;;  %v2337_v10 = vld [vmem:[%s2950_s14 + $0x2f0] ss:$8 sps:$4 sm:$0xff]  }
 0x1c2   : > { %1493 = vmatpush1.bf16.msra.mxu1 %v2276_v29  ;;  %v2340_v11 = vld [vmem:[%s2950_s14 + $0x104] ss:$8 sps:$4 sm:$0xff]   ;;  %v686_v12 = vld [vmem:[#allocation2] sm:$0xff]  ;;  %v2338_v15 = vld [vmem:[%s2950_s14 + $0x100] ss:$8 sps:$4 sm:$0xff]  }
 0x1c3   : > { %1575 = vmatpush1.bf16.msra.mxu0 %v2277_v30  ;;  %1494 = vmatprep.subr.bf16.mxu1 %v2278_v31  ;;  %v690_v13 = vld [vmem:[#allocation2 + $0x20] sm:$0xff]  ;;  %v2343_v14 = vld [vmem:[%s2950_s14 + $0x304] ss:$8 sps:$4 sm:$0xff]   ;;  %v2341_v16 = vld [vmem:[%s2950_s14 + $0x300] ss:$8 sps:$4 sm:$0xff]   ;;  %v694_v17 = vpack.c.bf16 %v686_v12, %v686_v12 }
 0x1c4   : > { %1576 = vmatprep.subr.bf16.mxu0 %v2280_v32  ;;  %v698_v18 = vpack.c.bf16 %v690_v13, %v690_v13  ;;  %v2346_v19 = vld [vmem:[%s2950_s14 + $0x114] ss:$8 sps:$4 sm:$0xff]   ;;  %v2344_v21 = vld [vmem:[%s2950_s14 + $0x110] ss:$8 sps:$4 sm:$0xff]   ;;  %v2352_v23 = vld [vmem:[%s2950_s14 + $0x124] ss:$8 sps:$4 sm:$0xff]  }
 0x1c5   : > { %v2349_v20 = vld [vmem:[%s2950_s14 + $0x314] ss:$8 sps:$4 sm:$0xff]   ;;  %v2347_v22 = vld [vmem:[%s2950_s14 + $0x310] ss:$8 sps:$4 sm:$0xff]   ;;  %v2355_v24 = vld [vmem:[%s2950_s14 + $0x324] ss:$8 sps:$4 sm:$0xff]  }
 0x1c6   : > { %1495 = vmatpush1.bf16.msra.mxu1 %v2282_v33  ;;  %v2350_v25 = vld [vmem:[%s2950_s14 + $0x120] ss:$8 sps:$4 sm:$0xff]   ;;  %v2358_v27 = vld [vmem:[%s2950_s14 + $0x134] ss:$8 sps:$4 sm:$0xff]   ;;  %v2356_v29 = vld [vmem:[%s2950_s14 + $0x130] ss:$8 sps:$4 sm:$0xff]  }
 0x1c7   : > { %1577 = vmatpush1.bf16.msra.mxu0 %v2283_v34  ;;  %1496 = vmatprep.subr.bf16.mxu1 %v2284_v35  ;;  %v2353_v26 = vld [vmem:[%s2950_s14 + $0x320] ss:$8 sps:$4 sm:$0xff]   ;;  %v2361_v28 = vld [vmem:[%s2950_s14 + $0x334] ss:$8 sps:$4 sm:$0xff]   ;;  %v2359_v30 = vld [vmem:[%s2950_s14 + $0x330] ss:$8 sps:$4 sm:$0xff]  }
 0x1c8   : > { %1578 = vmatprep.subr.bf16.mxu0 %v2286_v36  ;;  %v2364_v31 = vld [vmem:[%s2950_s14 + $0x144] ss:$8 sps:$4 sm:$0xff]   ;;  %v2362_v33 = vld [vmem:[%s2950_s14 + $0x140] ss:$8 sps:$4 sm:$0xff]   ;;  %v2370_v35 = vld [vmem:[%s2950_s14 + $0x154] ss:$8 sps:$4 sm:$0xff]  }
 0x1c9   : > { %v2367_v32 = vld [vmem:[%s2950_s14 + $0x344] ss:$8 sps:$4 sm:$0xff]   ;;  %v2365_v34 = vld [vmem:[%s2950_s14 + $0x340] ss:$8 sps:$4 sm:$0xff]   ;;  %v2373_v36 = vld [vmem:[%s2950_s14 + $0x354] ss:$8 sps:$4 sm:$0xff]  }
 0x1ca   : > { %1497 = vmatpush1.bf16.msra.mxu1 %v2288_v37  ;;  %v2368_v37 = vld [vmem:[%s2950_s14 + $0x150] ss:$8 sps:$4 sm:$0xff]   ;;  %v2386_v53 = vld [vmem:[%s2950_s14 + $0x180] ss:$8 sps:$4 sm:$0xff]   ;;  %v2394_v55 = vld [vmem:[%s2950_s14 + $0x194] ss:$8 sps:$4 sm:$0xff]  }
 0x1cb   : > { %1579 = vmatpush1.bf16.msra.mxu0 %v2289_v38  ;;  %1498 = vmatprep.subr.bf16.mxu1 %v2290_v39  ;;  %v2371_v38 = vld [vmem:[%s2950_s14 + $0x350] ss:$8 sps:$4 sm:$0xff]   ;;  %v2376_v39 = vld [vmem:[%s2950_s14 + $0x164] ss:$8 sps:$4 sm:$0xff]   ;;  %v2422_v13 = vld [vmem:[%s2950_s14 + $0x1e0] ss:$8 sps:$4 sm:$0xff]  }
 0x1cc   : > { %1580 = vmatprep.subr.bf16.mxu0 %v2292_v40  ;;  %v2379_v40 = vld [vmem:[%s2950_s14 + $0x364] ss:$8 sps:$4 sm:$0xff]   ;;  %v2392_v57 = vld [vmem:[%s2950_s14 + $0x190] ss:$8 sps:$4 sm:$0xff]  }
 0x1cd   : > { %v2403_v60 = vld [vmem:[%s2950_s14 + $0x3a4] ss:$8 sps:$4 sm:$0xff]  }
 0x1ce   : > { %1499 = vmatpush1.bf16.msra.mxu1 %v2294_v41  ;;  %v689_v41 = vld [vmem:[#allocation2 + $0x18] sm:$0xff] }
 0x1cf   : > { %1581 = vmatpush1.bf16.msra.mxu0 %v2295_v42  ;;  %1500 = vmatprep.subr.bf16.mxu1 %v2296_v43  ;;  %v2374_v42 = vld [vmem:[%s2950_s14 + $0x160] ss:$8 sps:$4 sm:$0xff]   ;;  %v2427_v12 = vld [vmem:[%s2950_s14 + $0x3e4] ss:$8 sps:$4 sm:$0xff]  }
 0x1d0   : > { %1582 = vmatprep.subr.bf16.mxu0 %v2298_v44  ;;  %v2377_v43 = vld [vmem:[%s2950_s14 + $0x360] ss:$8 sps:$4 sm:$0xff]   ;;  %v697_v44 = vpack.c.bf16 %v689_v41, %v689_v41 }
 0x1d2   : > { %1501 = vmatpush1.bf16.msra.mxu1 %v2300_v45  ;;  %v693_v45 = vld [vmem:[#allocation2 + $0x38] sm:$0xff] }
 0x1d3   : > { %1583 = vmatpush1.bf16.msra.mxu0 %v2301_v46  ;;  %1502 = vmatprep.subr.bf16.mxu1 %v2302_v47  ;;  %v2382_v46 = vld [vmem:[%s2950_s14 + $0x174] ss:$8 sps:$4 sm:$0xff]   ;;  %v701_v47 = vpack.c.bf16 %v693_v45, %v693_v45 }
 0x1d4   : > { %1584 = vmatprep.subr.bf16.mxu0 %v2304_v48  ;;  %v2385_v48 = vld [vmem:[%s2950_s14 + $0x374] ss:$8 sps:$4 sm:$0xff]  }
 0x1d6   : > { %1503 = vmatpush1.bf16.msra.mxu1 %v2306_v49  ;;  %v2380_v49 = vld [vmem:[%s2950_s14 + $0x170] ss:$8 sps:$4 sm:$0xff]  }
 0x1d7   : > { %1585 = vmatpush1.bf16.msra.mxu0 %v2307_v50  ;;  %1504 = vmatprep.subr.bf16.mxu1 %v2308_v51  ;;  %v2383_v50 = vld [vmem:[%s2950_s14 + $0x370] ss:$8 sps:$4 sm:$0xff]   ;;  %v2388_v51 = vld [vmem:[%s2950_s14 + $0x184] ss:$8 sps:$4 sm:$0xff]  }
 0x1d8   : > { %1586 = vmatprep.subr.bf16.mxu0 %v2310_v52  ;;  %v2391_v52 = vld [vmem:[%s2950_s14 + $0x384] ss:$8 sps:$4 sm:$0xff]  }
 0x1da   : > { %1505 = vmatpush1.bf16.msra.mxu1 %v2312_v54  ;;  %v2389_v54 = vld [vmem:[%s2950_s14 + $0x380] ss:$8 sps:$4 sm:$0xff]  }
 0x1db   : > { %1587 = vmatpush1.bf16.msra.mxu0 %v2313_v56  ;;  %1506 = vmatprep.subr.bf16.mxu1 %v2314_v58  ;;  %v2397_v56 = vld [vmem:[%s2950_s14 + $0x394] ss:$8 sps:$4 sm:$0xff]   ;;  %v2395_v58 = vld [vmem:[%s2950_s14 + $0x390] ss:$8 sps:$4 sm:$0xff]  }
 0x1dc   : > { %1588 = vmatprep.subr.bf16.mxu0 %v2316_v59  ;;  %v2400_v59 = vld [vmem:[%s2950_s14 + $0x1a4] ss:$8 sps:$4 sm:$0xff]  }
 0x1de   : > { %1507 = vmatpush1.bf16.msra.mxu1 %v2318_v61  ;;  %v2398_v61 = vld [vmem:[%s2950_s14 + $0x1a0] ss:$8 sps:$4 sm:$0xff]  }
 0x1df   : > { %1589 = vmatpush1.bf16.msra.mxu0 %v2319_v62  ;;  %1508 = vmatprep.subr.bf16.mxu1 %v2320_v63  ;;  %v2401_v62 = vld [vmem:[%s2950_s14 + $0x3a0] ss:$8 sps:$4 sm:$0xff]   ;;  %v2406_v63 = vld [vmem:[%s2950_s14 + $0x1b4] ss:$8 sps:$4 sm:$0xff]  }
 0x1e0   : > { %1590 = vmatprep.subr.bf16.mxu0 %v2322_v0  ;;  %v2409_v0 = vld [vmem:[%s2950_s14 + $0x3b4] ss:$8 sps:$4 sm:$0xff]  }
 0x1e2   : > { %1509 = vmatpush1.bf16.msra.mxu1 %v2324_v1  ;;  %v2404_v1 = vld [vmem:[%s2950_s14 + $0x1b0] ss:$8 sps:$4 sm:$0xff]  }
 0x1e3   : > { %1591 = vmatpush1.bf16.msra.mxu0 %v2325_v2  ;;  %1510 = vmatprep.subr.bf16.mxu1 %v2326_v3  ;;  %v2407_v2 = vld [vmem:[%s2950_s14 + $0x3b0] ss:$8 sps:$4 sm:$0xff]   ;;  %v2412_v3 = vld [vmem:[%s2950_s14 + $0x1c4] ss:$8 sps:$4 sm:$0xff]  }
 0x1e4   : > { %1592 = vmatprep.subr.bf16.mxu0 %v2328_v4  ;;  %v2415_v4 = vld [vmem:[%s2950_s14 + $0x3c4] ss:$8 sps:$4 sm:$0xff]  }
 0x1e6   : > { %1511 = vmatpush1.bf16.msra.mxu1 %v2330_v5  ;;  %v2410_v5 = vld [vmem:[%s2950_s14 + $0x1c0] ss:$8 sps:$4 sm:$0xff]  }
 0x1e7   : > { %1593 = vmatpush1.bf16.msra.mxu0 %v2331_v6  ;;  %1512 = vmatprep.subr.bf16.mxu1 %v2332_v7  ;;  %v2413_v6 = vld [vmem:[%s2950_s14 + $0x3c0] ss:$8 sps:$4 sm:$0xff]   ;;  %v2418_v7 = vld [vmem:[%s2950_s14 + $0x1d4] ss:$8 sps:$4 sm:$0xff]  }
 0x1e8   : > { %1594 = vmatprep.subr.bf16.mxu0 %v2334_v8  ;;  %v2421_v8 = vld [vmem:[%s2950_s14 + $0x3d4] ss:$8 sps:$4 sm:$0xff]  }
 0x1ea   : > { %1513 = vmatpush1.bf16.msra.mxu1 %v2336_v9  ;;  %v2416_v9 = vld [vmem:[%s2950_s14 + $0x1d0] ss:$8 sps:$4 sm:$0xff]  }
 0x1eb   : > { %1595 = vmatpush1.bf16.msra.mxu0 %v2337_v10  ;;  %1523 = vmatprep.subr.bf16.mxu1 %v2340_v11  ;;  %v2419_v10 = vld [vmem:[%s2950_s14 + $0x3d0] ss:$8 sps:$4 sm:$0xff]   ;;  %v2424_v11 = vld [vmem:[%s2950_s14 + $0x1e4] ss:$8 sps:$4 sm:$0xff]  }
 0x1ec   : > { %1605 = vmatprep.subr.bf16.mxu0 %v2343_v14  ;;  %v2425_v14 = vld [vmem:[%s2950_s14 + $0x3e0] ss:$8 sps:$4 sm:$0xff]  }
 0x1ed   : > { %1515 = vmatmul.mubr.bf16.vlgmr.msra.gmra.mrb[0].mxu1 %v694_v17  ;;  %v2428_v17 = vld [vmem:[%s2950_s14 + $0x1f0] ss:$8 sps:$4 sm:$0xff]  }
 0x1ee   : > { %1597 = vmatmul.mubr.bf16.vlgmr.msra.gmra.mrb[0].mxu0 %v698_v18  ;;  %1524 = vmatpush1.bf16.msra.mxu1 %v2338_v15  ;;  %v2430_v15 = vld [vmem:[%s2950_s14 + $0x1f4] ss:$8 sps:$4 sm:$0xff]   ;;  %v2431_v18 = vld [vmem:[%s2950_s14 + $0x3f0] ss:$8 sps:$4 sm:$0xff]  }
 0x1ef   : > { %1606 = vmatpush1.bf16.msra.mxu0 %v2341_v16  ;;  %1525 = vmatprep.subr.bf16.mxu1 %v2346_v19  ;;  %v2433_v16 = vld [vmem:[%s2950_s14 + $0x3f4] ss:$8 sps:$4 sm:$0xff]   ;;  %v688_v19 = vld [vmem:[#allocation2 + $0x10] sm:$0xff] }
 0x1f0   : > { %1607 = vmatprep.subr.bf16.mxu0 %v2349_v20  ;;  %1555 = vmatprep.mubr.bf16.mxu1 %v697_v44  ;;  %v692_v20 = vld [vmem:[#allocation2 + $0x30] sm:$0xff] }
 0x1f1   : > { %1637 = vmatprep.mubr.bf16.mxu0 %v701_v47 }
 0x1f2   : > { %1526 = vmatpush1.bf16.msra.mxu1 %v2344_v21  ;;  %v2434_v21 = vld [vmem:[%s2967_s29 + $0x40] sm:$0xff]  }
 0x1f3   : > { %1608 = vmatpush1.bf16.msra.mxu0 %v2347_v22  ;;  %1527 = vmatprep.subr.bf16.mxu1 %v2352_v23  ;;  %v696_v22 = vpack.c.bf16 %v688_v19, %v688_v19  ;;  %v700_v23 = vpack.c.bf16 %v692_v20, %v692_v20 }
 0x1f4   : > { %1609 = vmatprep.subr.bf16.mxu0 %v2355_v24  ;;  %v2435_v24 = vld [vmem:[%s2967_s29] sm:$0xff]  }
 0x1f6   : > { %1528 = vmatpush1.bf16.msra.mxu1 %v2350_v25  ;;  %v2436_v25 = vld [vmem:[%s2967_s29 + $0x48] sm:$0xff]  }
 0x1f7   : > { %1610 = vmatpush1.bf16.msra.mxu0 %v2353_v26  ;;  %1529 = vmatprep.subr.bf16.mxu1 %v2358_v27  ;;  %v2437_v26 = vld [vmem:[%s2967_s29 + $0x8] sm:$0xff]   ;;  %v2438_v27 = vld [vmem:[%s2967_s29 + $0x50] sm:$0xff]  }
 0x1f8   : > { %1611 = vmatprep.subr.bf16.mxu0 %v2361_v28  ;;  %v2439_v28 = vld [vmem:[%s2967_s29 + $0x10] sm:$0xff]  }
 0x1fa   : > { %1530 = vmatpush1.bf16.msra.mxu1 %v2356_v29  ;;  %v2440_v29 = vld [vmem:[%s2967_s29 + $0x58] sm:$0xff]  }
 0x1fb   : > { %1612 = vmatpush1.bf16.msra.mxu0 %v2359_v30  ;;  %1531 = vmatprep.subr.bf16.mxu1 %v2364_v31  ;;  %v2441_v30 = vld [vmem:[%s2967_s29 + $0x18] sm:$0xff]   ;;  %v2442_v31 = vld [vmem:[%s2967_s29 + $0x60] sm:$0xff]  }
 0x1fc   : > { %1613 = vmatprep.subr.bf16.mxu0 %v2367_v32  ;;  %v2443_v32 = vld [vmem:[%s2967_s29 + $0x20] sm:$0xff]  }
 0x1fe   : > { %1532 = vmatpush1.bf16.msra.mxu1 %v2362_v33  ;;  %v2444_v33 = vld [vmem:[%s2967_s29 + $0x68] sm:$0xff]  }
 0x1ff   : > { %1614 = vmatpush1.bf16.msra.mxu0 %v2365_v34  ;;  %1533 = vmatprep.subr.bf16.mxu1 %v2370_v35  ;;  %v2445_v34 = vld [vmem:[%s2967_s29 + $0x28] sm:$0xff]   ;;  %v2446_v35 = vld [vmem:[%s2967_s29 + $0x70] sm:$0xff]  }
 0x200   : > { %1615 = vmatprep.subr.bf16.mxu0 %v2373_v36  ;;  %v2447_v36 = vld [vmem:[%s2967_s29 + $0x30] sm:$0xff]  }
 0x202   : > { %1534 = vmatpush1.bf16.msra.mxu1 %v2368_v37  ;;  %v2448_v37 = vld [vmem:[%s2967_s29 + $0x78] sm:$0xff]  }
 0x203   : > { %1616 = vmatpush1.bf16.msra.mxu0 %v2371_v38  ;;  %1535 = vmatprep.subr.bf16.mxu1 %v2376_v39  ;;  %v2449_v38 = vld [vmem:[%s2967_s29 + $0x38] sm:$0xff]   ;;  %v832_v39 = vlaneseq }
 0x204   : > { %1617 = vmatprep.subr.bf16.mxu0 %v2379_v40 }
 0x205   : > { %v833_v40 = vshrl.u32 %v832_v39, 7 }
 0x206   : > { %1536 = vmatpush1.bf16.msra.mxu1 %v2374_v42  ;;  %v830_v42 = vld [vmem:[%s348_s11] sm:$0x3] }
 0x207   : > { %1618 = vmatpush1.bf16.msra.mxu0 %v2377_v43  ;;  %1537 = vmatprep.subr.bf16.mxu1 %v2382_v46  ;;  %v834_v41 = vsub.s32 0, %v833_v40  ;;  %v838_v43 = vsub.s32 1, %v833_v40 }
 0x208   : > { %1619 = vmatprep.subr.bf16.mxu0 %v2385_v48 }
 0x209   : > { %v835_v44 = vrot.slane %v830_v42, %v834_v41  ;;  %v839_v45 = vrot.slane %v830_v42, %v838_v43 }
 0x20a   : > { %1538 = vmatpush1.bf16.msra.mxu1 %v2380_v49 }
 0x20b   : > { %1620 = vmatpush1.bf16.msra.mxu0 %v2383_v50  ;;  %1539 = vmatprep.subr.bf16.mxu1 %v2388_v51 }
 0x20c   : > { %1621 = vmatprep.subr.bf16.mxu0 %v2391_v52 }
 0x20e   : > { %1540 = vmatpush1.bf16.msra.mxu1 %v2386_v53 }
 0x20f   : > { %1622 = vmatpush1.bf16.msra.mxu0 %v2389_v54  ;;  %1541 = vmatprep.subr.bf16.mxu1 %v2394_v55 }
 0x210   : > { %1623 = vmatprep.subr.bf16.mxu0 %v2397_v56 }
 0x212   : > { %1542 = vmatpush1.bf16.msra.mxu1 %v2392_v57 }
 0x213   : > { %1624 = vmatpush1.bf16.msra.mxu0 %v2395_v58  ;;  %1543 = vmatprep.subr.bf16.mxu1 %v2400_v59 }
 0x214   : > { %1625 = vmatprep.subr.bf16.mxu0 %v2403_v60 }
 0x216   : > { %1544 = vmatpush1.bf16.msra.mxu1 %v2398_v61 }
 0x217   : > { %1626 = vmatpush1.bf16.msra.mxu0 %v2401_v62  ;;  %1545 = vmatprep.subr.bf16.mxu1 %v2406_v63  ;;  %v1648_v63 = vld [vmem:[%s3146_s7] sm:$0xff] }
 0x218   : > { %1627 = vmatprep.subr.bf16.mxu0 %v2409_v0 }
 0x21a   : > { %1546 = vmatpush1.bf16.msra.mxu1 %v2404_v1 }
 0x21b   : > { %1628 = vmatpush1.bf16.msra.mxu0 %v2407_v2  ;;  %1547 = vmatprep.subr.bf16.mxu1 %v2412_v3 }
 0x21c   : > { %1629 = vmatprep.subr.bf16.mxu0 %v2415_v4 }
 0x21e   : > { %1548 = vmatpush1.bf16.msra.mxu1 %v2410_v5 }
 0x21f   : > { %1630 = vmatpush1.bf16.msra.mxu0 %v2413_v6  ;;  %1549 = vmatprep.subr.bf16.mxu1 %v2418_v7 }
 0x220   : > { %1631 = vmatprep.subr.bf16.mxu0 %v2421_v8 }
 0x222   : > { %1550 = vmatpush1.bf16.msra.mxu1 %v2416_v9 }
 0x223   : > { %1632 = vmatpush1.bf16.msra.mxu0 %v2419_v10  ;;  %1551 = vmatprep.subr.bf16.mxu1 %v2424_v11 }
 0x224   : > { %1633 = vmatprep.subr.bf16.mxu0 %v2427_v12 }
 0x226   : > { %1552 = vmatpush1.bf16.msra.mxu1 %v2422_v13 }
 0x227   : > { %1634 = vmatpush1.bf16.msra.mxu0 %v2425_v14  ;;  %1553 = vmatprep.subr.bf16.mxu1 %v2430_v15 }
 0x228   : > { %1635 = vmatprep.subr.bf16.mxu0 %v2433_v16 }
 0x22a   : > { %1554 = vmatpush1.bf16.msra.mxu1 %v2428_v17 }
 0x22b   : > { %1636 = vmatpush1.bf16.msra.mxu0 %v2431_v18  ;;  %2118 = vmatprep.subr.bf16.mxu1 %v2434_v21 }
 0x22d   : > { %1556 = vmatmul.mubr.bf16.vlgmr.msra.gmra.mrb[0].mxu1 %v696_v22 }
 0x22e   : > { %1638 = vmatmul.mubr.bf16.vlgmr.msra.gmra.mrb[0].mxu0 %v700_v23  ;;  %2119 = vmatpush3.bf16.msra.mxu1 %v2435_v24 }
 0x22f   : > { %2120 = vmatprep.subr.bf16.mxu1 %v2436_v25 }
 0x232   : > { %2121 = vmatpush3.bf16.msra.mxu1 %v2437_v26 }
 0x233   : > { %2122 = vmatprep.subr.bf16.mxu1 %v2438_v27 }
 0x236   : > { %2123 = vmatpush3.bf16.msra.mxu1 %v2439_v28 }
 0x237   : > { %2124 = vmatprep.subr.bf16.mxu1 %v2440_v29 }
 0x23a   : > { %2125 = vmatpush3.bf16.msra.mxu1 %v2441_v30 }
 0x23b   : > { %2126 = vmatprep.subr.bf16.mxu1 %v2442_v31 }
 0x23e   : > { %2127 = vmatpush3.bf16.msra.mxu1 %v2443_v32 }
 0x23f   : > { %2128 = vmatprep.subr.bf16.mxu1 %v2444_v33 }
 0x242   : > { %2129 = vmatpush3.bf16.msra.mxu1 %v2445_v34 }
 0x243   : > { %2130 = vmatprep.subr.bf16.mxu1 %v2446_v35 }
 0x246   : > { %2131 = vmatpush3.bf16.msra.mxu1 %v2447_v36 }
 0x247   : > { %2132 = vmatprep.subr.bf16.mxu1 %v2448_v37 }
 0x24a   : > { %2133 = vmatpush3.bf16.msra.mxu1 %v2449_v38 }
 0x300   : > { %v1557_v46 = vpop.f32.mrb[0].mxu1 }
 0x301   : > { %v1639_v47 = vpop.f32.mrb[0].mxu0  ;;  %v2140_v48 = vadd.f32 %v1557_v46, %v835_v44  ;;  %v1559_v49 = vpop.f32.mrb[1].mxu1 }
 0x302   : > { %v1641_v50 = vpop.f32.mrb[1].mxu0  ;;  %v2142_v51 = vadd.f32 %v1559_v49, %v839_v45  ;;  %v1561_v52 = vpop.f32.mrb[2].mxu1 }
 0x303   : > { %v1643_v53 = vpop.f32.mrb[2].mxu0  ;;  %v2141_v54 = vadd.f32 %v2140_v48, %v1639_v47  ;;  %v1562_v55 = vpop.f32.mrb[3].mxu1 }
 0x304   : > { %v1644_v56 = vpop.f32.mrb[3].mxu0  ;;  %v2143_v57 = vadd.f32 %v2142_v51, %v1641_v50 }
 0x305   : > { %v1646_v58 = vmax.f32 %v2141_v54, 0.0 }
 0x306   : > { %v1647_v59 = vmax.f32 %v2143_v57, 0.0 }
 0x307   : > { %v1649_v61 = vpack.c.bf16 %v1646_v58, %v1646_v58 }
 0x308   : > { %v1650_v60 = vpack.c.bf16 %v1647_v59, %v1647_v59 }
 0x30a   : > { %1811 = vmatprep.mubr.bf16.mxu1 %v1650_v60 }
 0x30b   : > { %1812 = vmatmul.mubr.bf16.vlgmr.msra.gmra.mrb[4].mxu1 %v1649_v61 }
 0x3de   : > { %v2134_v62 = vpop.f32.mrb[4].mxu1 }
 0x3df   : > { %v2135_v0 = vpop.f32.mrb[5].mxu1 }
 0x3e0   : > { %v2136_v1 = vadd.f32 %v2135_v0, %v2134_v62  ;;  %v2137_v2 = vpop.f32.mrb[6].mxu1 }
 0x3e1   : > { %v2138_v3 = vpop.f32.mrb[7].mxu1 }
 0x3e2   : > { %v1819_v4 = vadd.f32 %v2136_v1, %v1648_v63 }
 0x3e4   : > { %1821 = vst.msk [vmem:[%s3146_s7] sm:$0xff] %vm1820_vm2, %v1819_v4 }
 0x3e5 PF: > { %s3183_s27 = sld [smem:[#allocation17_spill]]  ;;  %s3184_s15 = sld [smem:[#allocation18_spill]] }
 0x3e6   : > { %s3185_s24 = smov %s2660_s25  ;;  %s3186_s25 = smov %s2664_s26 }
 0x3eb   : > { %p20_p4 = scmp.ge.s32.totalorder %s3183_s27, 6   ;;  %s3187_s26 = smov %s3184_s15 }
 0x3ed   :  { %22 = sbr.rel (!%p20_p4) target bundleno = 9 (0x9), region = 119 }
 0x3f4   :  { %1833 = vsyncpa [#allocation4], 1 }
 0x3f5   :  { %1835 = vsyncpa [#allocation4 + $0x1], 1 }
 0x3f6   :  { %1836 = vsyncpa [#allocation6], 1 }
 0x3f7   :  { %1837 = vsyncpa [#allocation9], 1 }
 0x3f8   :  { %1839 = vsyncpa [#allocation9 + $0x1], 1 }
 0x3f9   :  { %1840 = vsyncpa [#allocation12], 1 }

</bundles_post_ra>
